<compile_context>
chip_gen: v7x
topology: tpu7x:2x2x1
jax: 0.10.0
libtpu: 0.0.40
codegen_flags: <defaults>
</compile_context>

<pallas_src>
import functools

import jax
import jax.numpy as jnp
from jax.experimental import pallas as pl
from jax.experimental.pallas import tpu as pltpu

# --- module constants (Conv_block_4 defaults) --------------------------------
KH, KW = 3, 9            # self.kernel_size = (3, 9)
SH, SW = 3, 3            # self.stride      = (3, 3)
IN_H, IN_W = 3, 300      # input spatial dims implied by the ln_in formula
K_IN = IN_H * IN_W       # 900 flattened input features per sample
OUT_W = (IN_W - KW) // SW + 1   # 98 = BatchNorm1d num_features
PAD_W = 128              # lane-dense padded feature width for conv/stats math
BN_EPS = 1e-5
SOFTPLUS_THRESHOLD = 20.0


def _round_up(a, b):
    return (a + b - 1) // b * b


def _physical_vmem_bytes():
    """Physical VMEM per core (128 MiB v5e/v6e, 64 MiB v7x). Conservative
    fallback of 64 MiB if the query is unavailable."""
    try:
        info = pltpu.get_tpu_info()
        for attr in ("vmem_capacity_bytes", "vmem_size_bytes", "vmem_bytes"):
            v = getattr(info, attr, None)
            if isinstance(v, int) and v > 0:
                return v
    except Exception:
        pass
    return 64 * 1024 * 1024


_PHYS_VMEM = _physical_vmem_bytes()
# Larger tiles on 128-MiB-VMEM chips; keep tighter on v7x (64 MiB).
_TILE_N_MAX = 2048 if _PHYS_VMEM >= (96 << 20) else 1024


# =============================================================================
# Fused single-call kernel: grid = (2, num_tiles)
#   pass 0 (p==0): conv matmul + resident stats, conv tile -> VMEM scratch
#   pass 1 (p==1): BN affine (precomputed scale/shift) + softplus -> output
# =============================================================================
def _fused_kernel(x_ref, w_ref, gamma_ref, beta_ref, o_ref,
                  conv_buf, s1, s2, scale, shift,
                  *, n_real, tile_n, num_tiles):
    p = pl.program_id(0)
    i = pl.program_id(1)

    @pl.when((p == 0) & (i == 0))
    def _init():
        s1[...] = jnp.zeros_like(s1)
        s2[...] = jnp.zeros_like(s2)

    @pl.when(p == 0)
    def _conv_and_stats():
        conv = jnp.dot(x_ref[...], w_ref[...],
                       preferred_element_type=jnp.float32)   # (tile_n, 128)
        conv_buf[i] = conv                                    # resident in VMEM
        if n_real % tile_n != 0:
            # Mask garbage rows of the (only) partial tile out of the stats.
            row = i * tile_n + jax.lax.broadcasted_iota(jnp.int32, (tile_n, 1), 0)
            conv = jnp.where(row < n_real, conv, 0.0)
        s1[...] += jnp.sum(conv, axis=0, keepdims=True)
        s2[...] += jnp.sum(conv * conv, axis=0, keepdims=True)

    @pl.when((p == 0) & (i == num_tiles - 1))
    def _finalize_stats():
        inv_n = jnp.float32(1.0 / n_real)                     # REAL batch size
        mean = s1[...] * inv_n
        var = jnp.maximum(s2[...] * inv_n - mean * mean, 0.0)  # biased variance
        sc = gamma_ref[...] * jax.lax.rsqrt(var + BN_EPS)
        scale[...] = sc
        shift[...] = beta_ref[...] - mean * sc

    @pl.when(p == 1)
    def _bn_softplus():
        y = conv_buf[i] * scale[...] + shift[...]             # (tile_n, 128)
        # PyTorch Softplus threshold semantics: linear for y > 20.
        sp = jnp.log1p(jnp.exp(jnp.minimum(y, SOFTPLUS_THRESHOLD)))
        out = jnp.where(y > SOFTPLUS_THRESHOLD, y, sp)
        o_ref[...] = out[:, :OUT_W]                           # masked 98-wide vst


# =============================================================================
# Fallback 2-call path (conv intermediate via HBM) for very large batches.
# =============================================================================
def _conv_stats_kernel(x_ref, w_ref, conv_ref, s1_ref, s2_ref,
                       *, n_real, tile_n):
    i = pl.program_id(0)

    @pl.when(i == 0)
    def _():
        s1_ref[...] = jnp.zeros_like(s1_ref)
        s2_ref[...] = jnp.zeros_like(s2_ref)

    conv = jnp.dot(x_ref[...], w_ref[...], preferred_element_type=jnp.float32)
    conv_ref[...] = conv
    if n_real % tile_n != 0:
        row = i * tile_n + jax.lax.broadcasted_iota(jnp.int32, (tile_n, 1), 0)
        conv = jnp.where(row < n_real, conv, 0.0)
    s1_ref[...] += jnp.sum(conv, axis=0, keepdims=True)
    s2_ref[...] += jnp.sum(conv * conv, axis=0, keepdims=True)


def _bn_softplus_kernel(conv_ref, scale_ref, shift_ref, o_ref):
    y = conv_ref[...] * scale_ref[...] + shift_ref[...]
    sp = jnp.log1p(jnp.exp(jnp.minimum(y, SOFTPLUS_THRESHOLD)))
    o_ref[...] = jnp.where(y > SOFTPLUS_THRESHOLD, y, sp)[:, :OUT_W]


# --- parameter setup (run once, NOT per forward) ------------------------------
def build_toeplitz(conv_w):
    """conv_w: (KH, KW). Returns (900, 128) lane-padded Toeplitz matrix so that
    x.reshape(N, 900) @ Wm == Conv2d(x) flattened (cols 98..127 are zero)."""
    conv_w = jnp.asarray(conv_w, jnp.float32).reshape(KH, KW)
    kh = jnp.arange(KH)[:, None, None]
    kw = jnp.arange(KW)[None, :, None]
    col = jnp.arange(OUT_W)[None, None, :]
    rows = (kh * IN_W + SW * col + kw).reshape(-1)
    cols = jnp.broadcast_to(col, (KH, KW, OUT_W)).reshape(-1)
    vals = jnp.broadcast_to(conv_w[:, :, None], (KH, KW, OUT_W)).reshape(-1)
    wm = jnp.zeros((K_IN, PAD_W), jnp.float32)
    return wm.at[rows, cols].set(vals)          # single scatter


# --- forward ------------------------------------------------------------------
@functools.partial(jax.jit, static_argnames=("tile_n", "force_two_pass"))
def conv_block_4_forward(x, wmat, gamma, beta, *, tile_n=None,
                         force_two_pass=False):
    """x: (N, 1, 3, 300) float32, wmat: (900, 128) from build_toeplitz.
    Returns (N, 98) float32 (training-mode BatchNorm + Softplus)."""
    n = x.shape[0]
    if tile_n is None:
        tile_n = min(_TILE_N_MAX, _round_up(n, 8))
    assert tile_n % 8 == 0, "tile_n must be a multiple of 8"
    num_tiles = pl.cdiv(n, tile_n)

    x_flat = x.reshape(n, K_IN).astype(jnp.float32)   # free reshape, no pad

    gamma_p = jnp.zeros((1, PAD_W), jnp.float32).at[0, :OUT_W].set(
        gamma.astype(jnp.float32).reshape(-1))
    beta_p = jnp.zeros((1, PAD_W), jnp.float32).at[0, :OUT_W].set(
        beta.astype(jnp.float32).reshape(-1))

    # --- VMEM budgeting (per generation) --------------------------------------
    x_dbuf = 2 * tile_n * K_IN * 4
    out_dbuf = 2 * tile_n * PAD_W * 4
    w_dbuf = 2 * K_IN * PAD_W * 4
    small = 1 << 20
    conv_scratch_bytes = num_tiles * tile_n * PAD_W * 4
    fused_required = conv_scratch_bytes + x_dbuf + out_dbuf + w_dbuf + small
    fused_cap = int(_PHYS_VMEM * 0.70)          # ~45 MiB v7x, ~90 MiB v5e/v6e

    def _vmem_limit(required):
        return int(min(_PHYS_VMEM - (8 << 20),
                       max(32 << 20, required + (8 << 20))))

    use_fused = (not force_two_pass) and (fused_required <= fused_cap)

    if use_fused:
        out = pl.pallas_call(
            functools.partial(_fused_kernel, n_real=n, tile_n=tile_n,
                              num_tiles=num_tiles),
            out_shape=jax.ShapeDtypeStruct((n, OUT_W), jnp.float32),
            grid=(2, num_tiles),
            in_specs=[
                # x: advances during pass 0, frozen on the last tile in pass 1
                # (same block index => no redundant re-fetch).
                pl.BlockSpec((tile_n, K_IN),
                             lambda p, i: (i * (1 - p) + (num_tiles - 1) * p, 0)),
                pl.BlockSpec((K_IN, PAD_W), lambda p, i: (0, 0)),   # Toeplitz W
                pl.BlockSpec((1, PAD_W), lambda p, i: (0, 0)),      # gamma
                pl.BlockSpec((1, PAD_W), lambda p, i: (0, 0)),      # beta
            ],
            # Output only advances during pass 1 (pass 0 parks on block 0,
            # which is not written back until pass 1 has filled it).
            out_specs=pl.BlockSpec((tile_n, OUT_W), lambda p, i: (i * p, 0)),
            scratch_shapes=[
                pltpu.VMEM((num_tiles, tile_n, PAD_W), jnp.float32),  # conv
                pltpu.VMEM((1, PAD_W), jnp.float32),                  # s1
                pltpu.VMEM((1, PAD_W), jnp.float32),                  # s2
                pltpu.VMEM((1, PAD_W), jnp.float32),                  # scale
                pltpu.VMEM((1, PAD_W), jnp.float32),                  # shift
            ],
            compiler_params=pltpu.CompilerParams(
                dimension_semantics=("arbitrary", "arbitrary"),
                vmem_limit_bytes=_vmem_limit(fused_required),
            ),
        )(x_flat, wmat, gamma_p, beta_p)
        return out

    # --- fallback: 2-call path (conv intermediate via HBM) --------------------
    two_pass_required = x_dbuf + out_dbuf + w_dbuf + small
    vlim = _vmem_limit(two_pass_required)

    conv, s1, s2 = pl.pallas_call(
        functools.partial(_conv_stats_kernel, n_real=n, tile_n=tile_n),
        out_shape=(
            jax.ShapeDtypeStruct((n, PAD_W), jnp.float32),
            jax.ShapeDtypeStruct((1, PAD_W), jnp.float32),
            jax.ShapeDtypeStruct((1, PAD_W), jnp.float32),
        ),
        grid=(num_tiles,),
        in_specs=[
            pl.BlockSpec((tile_n, K_IN), lambda i: (i, 0)),
            pl.BlockSpec((K_IN, PAD_W), lambda i: (0, 0)),
        ],
        out_specs=(
            pl.BlockSpec((tile_n, PAD_W), lambda i: (i, 0)),
            pl.BlockSpec((1, PAD_W), lambda i: (0, 0)),     # resident s1
            pl.BlockSpec((1, PAD_W), lambda i: (0, 0)),     # resident s2
        ),
        compiler_params=pltpu.CompilerParams(
            dimension_semantics=("arbitrary",),             # sequential accum
            vmem_limit_bytes=vlim,
        ),
    )(x_flat, wmat)

    # Tiny (1,128) XLA epilogue: finalize scale/shift once (no per-tile rsqrt).
    inv_n = jnp.float32(1.0 / n)
    mean = s1 * inv_n
    var = jnp.maximum(s2 * inv_n - mean * mean, 0.0)
    scale = gamma_p * jax.lax.rsqrt(var + BN_EPS)
    shift = beta_p - mean * scale

    out = pl.pallas_call(
        _bn_softplus_kernel,
        out_shape=jax.ShapeDtypeStruct((n, OUT_W), jnp.float32),
        grid=(num_tiles,),
        in_specs=[
            pl.BlockSpec((tile_n, PAD_W), lambda i: (i, 0)),
            pl.BlockSpec((1, PAD_W), lambda i: (0, 0)),
            pl.BlockSpec((1, PAD_W), lambda i: (0, 0)),
        ],
        out_specs=pl.BlockSpec((tile_n, OUT_W), lambda i: (i, 0)),
        compiler_params=pltpu.CompilerParams(
            dimension_semantics=("parallel",),              # megacore on v7x
            vmem_limit_bytes=vlim,
        ),
    )(conv, scale, shift)
    return out


# --- plain-JAX reference for a sanity check -----------------------------------
def reference(x, conv_w, gamma, beta):
    patches = jnp.stack(
        [x[:, 0, :, SW * w: SW * w + KW] for w in range(OUT_W)], axis=1)
    conv = jnp.einsum("nwhk,hk->nw", patches, conv_w)            # (N, 98)
    mean = jnp.mean(conv, axis=0, keepdims=True)
    var = jnp.mean((conv - mean) ** 2, axis=0, keepdims=True)    # biased
    y = (conv - mean) / jnp.sqrt(var + BN_EPS) * gamma + beta
    return jnp.where(y > SOFTPLUS_THRESHOLD, y,
                     jnp.log1p(jnp.exp(jnp.minimum(y, SOFTPLUS_THRESHOLD))))


if __name__ == "__main__":
    key = jax.random.PRNGKey(0)
    kw_key, kx1, kx2, kx3, kx4 = jax.random.split(key, 5)

    # Deterministic parameter init mirroring _initialize_weights:
    # kaiming_normal_(fan_out, relu): std = sqrt(2 / (out_ch * KH * KW)); bias=0.
    fan_out = 1 * KH * KW
    std = (2.0 / fan_out) ** 0.5
    conv_w = std * jax.random.normal(kw_key, (KH, KW), dtype=jnp.float32)
    gamma = jnp.ones((OUT_W,), jnp.float32)     # BN affine weight
    beta = jnp.zeros((OUT_W,), jnp.float32)     # BN affine bias
    # conv bias (init 0) is intentionally unused: exactly cancelled by the
    # BatchNorm batch-mean subtraction in training mode.

    wmat = build_toeplitz(conv_w)               # hoisted out of the hot path

    def check(x, **kw):
        out = jax.block_until_ready(
            conv_block_4_forward(x, wmat, gamma, beta, **kw))
        ref = reference(x, conv_w, gamma, beta)
        assert out.shape == (x.shape[0], OUT_W), out.shape
        assert bool(jnp.allclose(out, ref, atol=1e-3, rtol=1e-3)), "mismatch"

    # aligned batch, single tile (fused path)
    check(jax.random.normal(kx1, (16, 1, IN_H, IN_W), dtype=jnp.float32))
    # ragged batch -> exercises in-kernel tail masking (no jnp.pad, no slice)
    check(jax.random.normal(kx2, (13, 1, IN_H, IN_W), dtype=jnp.float32))
    # multi-tile fused grid -> resident stats + 2-pass scheduling
    check(jax.random.normal(kx3, (32, 1, IN_H, IN_W), dtype=jnp.float32),
          tile_n=8)
    # exercise the large-batch 2-call fallback path explicitly
    check(jax.random.normal(kx4, (24, 1, IN_H, IN_W), dtype=jnp.float32),
          tile_n=8, force_two_pass=True)

    print("KERNEL_OK")
</pallas_src>

<mosaic_0001>
module attributes {stable_mosaic.version = 11 : i64} {
  func.func @_fused_kernel(%arg0: i32, %arg1: i32, %arg2: memref<16x900xf32, #tpu.memory_space<vmem>>, %arg3: memref<900x128xf32, #tpu.memory_space<vmem>>, %arg4: memref<1x128xf32, #tpu.memory_space<vmem>>, %arg5: memref<1x128xf32, #tpu.memory_space<vmem>>, %arg6: memref<16x98xf32, #tpu.memory_space<vmem>>, %arg7: memref<1x16x128xf32, #tpu.memory_space<vmem>>, %arg8: memref<1x128xf32, #tpu.memory_space<vmem>>, %arg9: memref<1x128xf32, #tpu.memory_space<vmem>>, %arg10: memref<1x128xf32, #tpu.memory_space<vmem>>, %arg11: memref<1x128xf32, #tpu.memory_space<vmem>>) attributes {dimension_semantics = [#tpu.dimension_semantics<arbitrary>, #tpu.dimension_semantics<arbitrary>], iteration_bounds = array<i64: 2, 1>, scalar_prefetch = 0 : i64, scratch_operands = 5 : i64, tpu.core_type = #tpu.core_type<tc>, window_params = [{transform_indices = @transform_0, window_bounds = array<i64: 16, 900>}, {pipeline_mode = #tpu.pipeline_mode<synchronous>, transform_indices = @transform_1, window_bounds = array<i64: 900, 128>}, {pipeline_mode = #tpu.pipeline_mode<synchronous>, transform_indices = @transform_2, window_bounds = array<i64: 1, 128>}, {pipeline_mode = #tpu.pipeline_mode<synchronous>, transform_indices = @transform_3, window_bounds = array<i64: 1, 128>}, {transform_indices = @transform_4, window_bounds = array<i64: 16, 98>}]} {
    %c0_i32 = arith.constant 0 : i32
    %0 = arith.cmpi eq, %arg0, %c0_i32 : i32
    %c0_i32_0 = arith.constant 0 : i32
    %1 = arith.cmpi eq, %arg1, %c0_i32_0 : i32
    %2 = arith.andi %0, %1 : i1
    %3 = arith.extui %2 : i1 to i32
    %c0_i32_1 = arith.constant 0 : i32
    %4 = arith.cmpi ne, %3, %c0_i32_1 : i32
    scf.if %4 {
      %cst = arith.constant 0.000000e+00 : f32
      %16 = vector.broadcast %cst : f32 to vector<1x128xf32>
      %c0 = arith.constant 0 : index
      %c0_8 = arith.constant 0 : index
      %17 = vector.load %arg8[%c0, %c0_8] : memref<1x128xf32, #tpu.memory_space<vmem>>, vector<1x128xf32>
      tpu.vector_store %arg8[%c0, %c0_8], %16 {strides = array<i32>} : memref<1x128xf32, #tpu.memory_space<vmem>>, vector<1x128xf32>,
      %cst_9 = arith.constant 0.000000e+00 : f32
      %18 = vector.broadcast %cst_9 : f32 to vector<1x128xf32>
      %c0_10 = arith.constant 0 : index
      %c0_11 = arith.constant 0 : index
      %19 = vector.load %arg9[%c0_10, %c0_11] : memref<1x128xf32, #tpu.memory_space<vmem>>, vector<1x128xf32>
      tpu.vector_store %arg9[%c0_10, %c0_11], %18 {strides = array<i32>} : memref<1x128xf32, #tpu.memory_space<vmem>>, vector<1x128xf32>,
    } else {
    }
    %c0_i32_2 = arith.constant 0 : i32
    %5 = arith.cmpi eq, %arg0, %c0_i32_2 : i32
    %6 = arith.extui %5 : i1 to i32
    %c0_i32_3 = arith.constant 0 : i32
    %7 = arith.cmpi ne, %6, %c0_i32_3 : i32
    scf.if %7 {
      %c0 = arith.constant 0 : index
      %c0_8 = arith.constant 0 : index
      %16 = vector.load %arg2[%c0, %c0_8] : memref<16x900xf32, #tpu.memory_space<vmem>>, vector<16x900xf32>
      %c0_9 = arith.constant 0 : index
      %c0_10 = arith.constant 0 : index
      %17 = vector.load %arg3[%c0_9, %c0_10] : memref<900x128xf32, #tpu.memory_space<vmem>>, vector<900x128xf32>
      %cst = arith.constant dense<0.000000e+00> : vector<16x128xf32>
      %18 = tpu.matmul %16, %17, %cst {dimension_numbers = #tpu.dot_dimension_numbers<[1], [0], [0], [1], [0, 0, 1, 1], [], []>} : vector<16x900xf32>, vector<900x128xf32>, vector<16x128xf32> -> vector<16x128xf32>
      %19 = arith.index_cast %arg1 : i32 to index
      %c0_11 = arith.constant 0 : index
      %c0_12 = arith.constant 0 : index
      %20 = vector.load %arg7[%19, %c0_11, %c0_12] : memref<1x16x128xf32, #tpu.memory_space<vmem>>, vector<1x16x128xf32>
      %21 = vector.shape_cast %20 : vector<1x16x128xf32> to vector<16x128xf32>
      %22 = vector.shape_cast %18 : vector<16x128xf32> to vector<1x16x128xf32>
      tpu.vector_store %arg7[%19, %c0_11, %c0_12], %22 {strides = array<i32>} : memref<1x16x128xf32, #tpu.memory_space<vmem>>, vector<1x16x128xf32>,
      %c0_13 = arith.constant 0 : index
      %c0_14 = arith.constant 0 : index
      %23 = vector.load %arg8[%c0_13, %c0_14] : memref<1x128xf32, #tpu.memory_space<vmem>>, vector<1x128xf32>
      %cst_15 = arith.constant dense<0.000000e+00> : vector<128xf32>
      %24 = vector.multi_reduction <add>, %18, %cst_15 [0] : vector<16x128xf32> to vector<128xf32>
      %25 = vector.shape_cast %24 : vector<128xf32> to vector<1x128xf32>
      %26 = arith.addf %23, %25 : vector<1x128xf32>
      %c0_16 = arith.constant 0 : index
      %c0_17 = arith.constant 0 : index
      %27 = vector.load %arg8[%c0_16, %c0_17] : memref<1x128xf32, #tpu.memory_space<vmem>>, vector<1x128xf32>
      tpu.vector_store %arg8[%c0_16, %c0_17], %26 {strides = array<i32>} : memref<1x128xf32, #tpu.memory_space<vmem>>, vector<1x128xf32>,
      %c0_18 = arith.constant 0 : index
      %c0_19 = arith.constant 0 : index
      %28 = vector.load %arg9[%c0_18, %c0_19] : memref<1x128xf32, #tpu.memory_space<vmem>>, vector<1x128xf32>
      %29 = arith.mulf %18, %18 : vector<16x128xf32>
      %cst_20 = arith.constant dense<0.000000e+00> : vector<128xf32>
      %30 = vector.multi_reduction <add>, %29, %cst_20 [0] : vector<16x128xf32> to vector<128xf32>
      %31 = vector.shape_cast %30 : vector<128xf32> to vector<1x128xf32>
      %32 = arith.addf %28, %31 : vector<1x128xf32>
      %c0_21 = arith.constant 0 : index
      %c0_22 = arith.constant 0 : index
      %33 = vector.load %arg9[%c0_21, %c0_22] : memref<1x128xf32, #tpu.memory_space<vmem>>, vector<1x128xf32>
      tpu.vector_store %arg9[%c0_21, %c0_22], %32 {strides = array<i32>} : memref<1x128xf32, #tpu.memory_space<vmem>>, vector<1x128xf32>,
    } else {
    }
    %c0_i32_4 = arith.constant 0 : i32
    %8 = arith.cmpi eq, %arg0, %c0_i32_4 : i32
    %c0_i32_5 = arith.constant 0 : i32
    %9 = arith.cmpi eq, %arg1, %c0_i32_5 : i32
    %10 = arith.andi %8, %9 : i1
    %11 = arith.extui %10 : i1 to i32
    %c0_i32_6 = arith.constant 0 : i32
    %12 = arith.cmpi ne, %11, %c0_i32_6 : i32
    scf.if %12 {
      %c0 = arith.constant 0 : index
      %c0_8 = arith.constant 0 : index
      %16 = vector.load %arg8[%c0, %c0_8] : memref<1x128xf32, #tpu.memory_space<vmem>>, vector<1x128xf32>
      %cst = arith.constant 6.250000e-02 : f32
      %17 = vector.broadcast %cst : f32 to vector<1x128xf32>
      %18 = arith.mulf %16, %17 : vector<1x128xf32>
      %c0_9 = arith.constant 0 : index
      %c0_10 = arith.constant 0 : index
      %19 = vector.load %arg9[%c0_9, %c0_10] : memref<1x128xf32, #tpu.memory_space<vmem>>, vector<1x128xf32>
      %cst_11 = arith.constant 6.250000e-02 : f32
      %20 = vector.broadcast %cst_11 : f32 to vector<1x128xf32>
      %21 = arith.mulf %19, %20 : vector<1x128xf32>
      %22 = arith.mulf %18, %18 : vector<1x128xf32>
      %23 = arith.subf %21, %22 : vector<1x128xf32>
      %cst_12 = arith.constant 0.000000e+00 : f32
      %24 = vector.broadcast %cst_12 : f32 to vector<1x128xf32>
      %25 = arith.maximumf %23, %24 : vector<1x128xf32>
      %c0_13 = arith.constant 0 : index
      %c0_14 = arith.constant 0 : index
      %26 = vector.load %arg4[%c0_13, %c0_14] : memref<1x128xf32, #tpu.memory_space<vmem>>, vector<1x128xf32>
      %cst_15 = arith.constant 9.99999974E-6 : f32
      %27 = vector.broadcast %cst_15 : f32 to vector<1x128xf32>
      %28 = arith.addf %25, %27 : vector<1x128xf32>
      %29 = math.rsqrt %28 : vector<1x128xf32>
      %30 = arith.mulf %26, %29 : vector<1x128xf32>
      %c0_16 = arith.constant 0 : index
      %c0_17 = arith.constant 0 : index
      %31 = vector.load %arg10[%c0_16, %c0_17] : memref<1x128xf32, #tpu.memory_space<vmem>>, vector<1x128xf32>
      tpu.vector_store %arg10[%c0_16, %c0_17], %30 {strides = array<i32>} : memref<1x128xf32, #tpu.memory_space<vmem>>, vector<1x128xf32>,
      %c0_18 = arith.constant 0 : index
      %c0_19 = arith.constant 0 : index
      %32 = vector.load %arg5[%c0_18, %c0_19] : memref<1x128xf32, #tpu.memory_space<vmem>>, vector<1x128xf32>
      %33 = arith.mulf %18, %30 : vector<1x128xf32>
      %34 = arith.subf %32, %33 : vector<1x128xf32>
      %c0_20 = arith.constant 0 : index
      %c0_21 = arith.constant 0 : index
      %35 = vector.load %arg11[%c0_20, %c0_21] : memref<1x128xf32, #tpu.memory_space<vmem>>, vector<1x128xf32>
      tpu.vector_store %arg11[%c0_20, %c0_21], %34 {strides = array<i32>} : memref<1x128xf32, #tpu.memory_space<vmem>>, vector<1x128xf32>,
    } else {
    }
    %c1_i32 = arith.constant 1 : i32
    %13 = arith.cmpi eq, %arg0, %c1_i32 : i32
    %14 = arith.extui %13 : i1 to i32
    %c0_i32_7 = arith.constant 0 : i32
    %15 = arith.cmpi ne, %14, %c0_i32_7 : i32
    scf.if %15 {
      %16 = arith.index_cast %arg1 : i32 to index
      %c0 = arith.constant 0 : index
      %c0_8 = arith.constant 0 : index
      %17 = vector.load %arg7[%16, %c0, %c0_8] : memref<1x16x128xf32, #tpu.memory_space<vmem>>, vector<1x16x128xf32>
      %18 = vector.shape_cast %17 : vector<1x16x128xf32> to vector<16x128xf32>
      %c0_9 = arith.constant 0 : index
      %c0_10 = arith.constant 0 : index
      %19 = vector.load %arg10[%c0_9, %c0_10] : memref<1x128xf32, #tpu.memory_space<vmem>>, vector<1x128xf32>
      %20 = vector.broadcast %19 : vector<1x128xf32> to vector<16x128xf32>
      %21 = arith.mulf %18, %20 : vector<16x128xf32>
      %c0_11 = arith.constant 0 : index
      %c0_12 = arith.constant 0 : index
      %22 = vector.load %arg11[%c0_11, %c0_12] : memref<1x128xf32, #tpu.memory_space<vmem>>, vector<1x128xf32>
      %23 = vector.broadcast %22 : vector<1x128xf32> to vector<16x128xf32>
      %24 = arith.addf %21, %23 : vector<16x128xf32>
      %cst = arith.constant 2.000000e+01 : f32
      %25 = vector.broadcast %cst : f32 to vector<16x128xf32>
      %26 = arith.minimumf %24, %25 : vector<16x128xf32>
      %27 = math.exp %26 : vector<16x128xf32>
      %28 = math.log1p %27 : vector<16x128xf32>
      %cst_13 = arith.constant 2.000000e+01 : f32
      %29 = vector.broadcast %cst_13 : f32 to vector<16x128xf32>
      %30 = arith.cmpf ogt, %24, %29 : vector<16x128xf32>
      %31 = arith.select %30, %24, %28 : vector<16x128xi1>, vector<16x128xf32>
      %32 = vector.extract_strided_slice %31 {offsets = [0, 0], sizes = [16, 98], strides = [1, 1]} : vector<16x128xf32> to vector<16x98xf32>
      %c0_14 = arith.constant 0 : index
      %c0_15 = arith.constant 0 : index
      %33 = vector.load %arg6[%c0_14, %c0_15] : memref<16x98xf32, #tpu.memory_space<vmem>>, vector<16x98xf32>
      tpu.vector_store %arg6[%c0_14, %c0_15], %32 {strides = array<i32>} : memref<16x98xf32, #tpu.memory_space<vmem>>, vector<16x98xf32>,
    } else {
    }
    return
  }
  func.func @transform_0(%arg0: i32, %arg1: i32) -> (i32, i32) {
    %c1_i32 = arith.constant 1 : i32
    %0 = arith.subi %c1_i32, %arg0 : i32
    %1 = arith.muli %arg1, %0 : i32
    %c0_i32 = arith.constant 0 : i32
    %2 = arith.muli %c0_i32, %arg0 : i32
    %3 = arith.addi %1, %2 : i32
    %c0_i32_0 = arith.constant 0 : i32
    %c0_i32_1 = arith.constant 0 : i32
    return %3, %c0_i32_0 : i32, i32
  }
  func.func @transform_1(%arg0: i32, %arg1: i32) -> (i32, i32) {
    %c0_i32 = arith.constant 0 : i32
    %c0_i32_0 = arith.constant 0 : i32
    %c0_i32_1 = arith.constant 0 : i32
    return %c0_i32, %c0_i32_0 : i32, i32
  }
  func.func @transform_2(%arg0: i32, %arg1: i32) -> (i32, i32) {
    %c0_i32 = arith.constant 0 : i32
    %c0_i32_0 = arith.constant 0 : i32
    %c0_i32_1 = arith.constant 0 : i32
    return %c0_i32, %c0_i32_0 : i32, i32
  }
  func.func @transform_3(%arg0: i32, %arg1: i32) -> (i32, i32) {
    %c0_i32 = arith.constant 0 : i32
    %c0_i32_0 = arith.constant 0 : i32
    %c0_i32_1 = arith.constant 0 : i32
    return %c0_i32, %c0_i32_0 : i32, i32
  }
  func.func @transform_4(%arg0: i32, %arg1: i32) -> (i32, i32) {
    %0 = arith.muli %arg1, %arg0 : i32
    %c0_i32 = arith.constant 0 : i32
    %c0_i32_0 = arith.constant 0 : i32
    return %0, %c0_i32 : i32, i32
  }
}

</mosaic_0001>

<bundles_post_ra>
// kernel: conv_block_4_forward.1
= control target key start
LH: loop header
LB: loop body
LE: loop exit
PB: predicated region body
PF: predicated region fallthrough
CT: control target
= control target key end

     0   :  { %9 = vsyncpa [#allocation8], 0  ;;  %s1507_s0 = inlined_call_operand.vmem [shape: f32[16,900], index: 0, kind: input, shape index: {}]   ;;  %s1508_s1 = inlined_call_operand.hbm [shape: f32[900,128], index: 1, kind: input, shape index: {}]   ;;  %s1509_s2 = inlined_call_operand.vmem [shape: f32[1,128], index: 2, kind: input, shape index: {}]   ;;  %s1510_s3 = inlined_call_operand.vmem [shape: f32[1,128], index: 3, kind: input, shape index: {}]   ;;  %s1511_s4 = inlined_call_operand.hbm [shape: f32[16,98], index: 4, kind: output, shape index: {}]  }
   0x1   :  { %10 = vsyncpa [#allocation9], 0 }
   0x2   :  { %12 = vsyncpa [#allocation9 + $0x1], 0  ;;  %s1338_s15 = smov 0   ;;  %s1340_s16 = smov 0  }
   0x3   :  { %s1342_s17 = smov 0  }
   0x4 LB: > { %s899_s18 = sadd.s32 4294967295, %s1302_s17   ;;  %s900_s19 = sadd.s32 4294967294, %s1302_s17   ;;  %s1302_s17 = sphi %s1342_s17, %s18_s17   ;;  %s1298_s16 = sphi %s1340_s16, %s1522_s16   ;;  %s1294_s15 = sphi %s1338_s15, %s1521_s15  }
   0x5   : > { %s30_s20 = sadd.s32 1, %s1298_s16  ;;  %p901_p0 = scmp.ge.s32.totalorder %s1302_s17, 1 }
   0x6   : > { %p32_p1 = scmp.ge.s32.totalorder %s30_s20, 2  ;;  %p156_p2 = scmp.lt.s32.totalorder %s1302_s17, 3 }
   0x7   : > { %p1360_p3 = scmp.eq.s32.totalorder %s899_s18, 0  ;;  %s1304_s23 = smov [#allocation7]  }
   0x8   : > { %s1524_s20 = smov (%p32_p1, %s30_s20), 0  ;;  %p1366_p4 = pnand %p901_p0, %p156_p2 }
   0x9   : > { %s1515_s21 = scalar_select %p1360_p3, 1, 0 }
   0xa   : > { %s1516_s22 = scalar_select %p1366_p4, 1, 0 }
   0xb   : > { %s168_s24 = sshll.u32 %s1304_s23, 4  ;;  %p1162_p5 = pneg %p1366_p4  ;;  %s169_s24 = int_to_ptr.vmem [resolvable:$true] %s168_s24 }
   0xc   : > { %s1218_s28 = scalar_lea.hbm %s1508_s1, 14464 }
   0xd   : > { %p1374_p6 = pnand %p1360_p3, %p1162_p5  ;;  %p1219_p7 = scmp.ne.s32.totalorder %s1508_s1, %s1218_s28 }
   0xe   : > { %p1225_p11 = scmp.lt.u32.totalorder %s1218_s28, %s1508_s1 }
   0xf   : > { %p1220_p8 = pneg %p1374_p6 }
  0x11   : > { %p1221_p9 = pnand %p1220_p8, %p1219_p7 }
  0x13   : > { %p1222_p10 = pneg %p1221_p9 }
  0x15   : > { %p1227_p12 = pnand %p1225_p11, %p1222_p10 }
  0x17   : > { %1230 = shalt.err (!%p1227_p12)
}
  0x18   : > { %s1231_s7 = scalar_lea.vmem %s169_s24, 14464  ;;  %p1239_p2 = scmp.lt.s32.totalorder %s169_s24, %s169_s24 }
  0x19   : > { %p1232_p13 = scmp.ne.s32.totalorder %s169_s24, %s1231_s7  ;;  %p1240_p5 = scmp.lt.s32.totalorder %s1231_s7, %s1231_s7 }
  0x1b   : > { %p1234_p0 = pnand %p1232_p13, %p1220_p8  ;;  %p1241_p3 = por %p1240_p5, %p1239_p2 }
  0x1d   : > { %p1235_p1 = pneg %p1234_p0 }
  0x1f   : > { %p1242_p4 = pnand %p1241_p3, %p1235_p1 }
  0x21   : > { %1245 = shalt.err (!%p1242_p4)
}
  0x22   : > { %s1305_s8 = smov 128   ;;  %s1306_s9 = smov 8  }
  0x23   : > { %1165 = dma.hbm_to_vmem [thread:$0]  (!%p1374_p6), %s1508_s1, 14464, %s169_s24, [#allocation8], %s1305_s8, %s1305_s8, %s1306_s9  }
  0x24   : > { %p1518_p7 = scmp.ne.s32.totalorder %s1516_s22, 0 }
  0x25   : > { %p1519_p9 = scmp.ne.s32.totalorder (!%p1518_p7), %s1515_s21, 0 }
  0x26   : > { %204 = sbr.rel (%p1518_p7) target bundleno = 466 (0x1d2), region = 36 }
  0x2d   : > { %1285 = dma.done.wait (%p1519_p9), [#allocation8], 14464  }
  0x2e   : > { %1287 = vsyncadd (%p1519_p9), [#allocation8], 4294952832  ;;  %p246_p3 = scmp.eq.s32.totalorder %s1294_s15, 0 }
  0x2f   : > { %v1307_v0 = vmov (%p246_p3), 0.0  }
  0x30   : > { %251 = sbr.rel (!%p246_p3) target bundleno = 55 (0x37), region = 44  ;;  %252 = vst [vmem:[#allocation3] sm:$0x1] (%p246_p3), %v1307_v0  ;;  %253 = vst [vmem:[#allocation4] sm:$0x1] (%p246_p3), %v1307_v0 }
  0x37 PF: > { %p908_p4 = scmp.ne.s32.totalorder %s1294_s15, 0 }
  0x38   : > { %v289_v1 = vld [vmem:[#allocation7 + $0x80] sm:$0xff] (!%p908_p4)  ;;  %v290_v2 = vld [vmem:[#allocation7 + $0x88] sm:$0xff] (!%p908_p4)  ;;  %v291_v12 = vld [vmem:[#allocation7 + $0x90] sm:$0xff] (!%p908_p4)  ;;  %vm386_vm0 = vcmask (!%p908_p4), 31744   ;;  %vm393_vm1 = vcmask (!%p908_p4), 1043456  }
  0x39   : > { %256 = sbr.rel (%p908_p4) target bundleno = 366 (0x16e), region = 48  ;;  %v321_v3 = vld [vmem:[#allocation7 + $0x180] sm:$0xff] (!%p908_p4)  ;;  %v1034_v4 = vpack.c.bf16 (!%p908_p4), %v290_v2, %v289_v1  ;;  %v322_v5 = vld [vmem:[#allocation7 + $0x188] sm:$0xff] (!%p908_p4)  ;;  %v292_v14 = vld [vmem:[#allocation7 + $0x98] sm:$0xff] (!%p908_p4) }
  0x3a   : > { %v273_v6 = vld [vmem:[#allocation7] sm:$0xff] (!%p908_p4)  ;;  %v274_v7 = vld [vmem:[#allocation7 + $0x8] sm:$0xff] (!%p908_p4)  ;;  %v1066_v8 = vpack.c.bf16 (!%p908_p4), %v322_v5, %v321_v3  ;;  %v323_v15 = vld [vmem:[#allocation7 + $0x190] sm:$0xff] (!%p908_p4)  ;;  %v1038_v17 = vpack.c.bf16 (!%p908_p4), %v292_v14, %v291_v12 }
  0x3b   : > { %v1036_v9 = vpack.c.bf16 (!%p908_p4), %v274_v7, %v273_v6  ;;  %v305_v10 = vld [vmem:[#allocation7 + $0x100] sm:$0xff] (!%p908_p4)  ;;  %v306_v11 = vld [vmem:[#allocation7 + $0x108] sm:$0xff] (!%p908_p4)  ;;  %1035 = vmatprep.subr.bf16.mxu0 (!%p908_p4), %v1034_v4  ;;  %v324_v16 = vld [vmem:[#allocation7 + $0x198] sm:$0xff] (!%p908_p4) }
  0x3c   : > { %v1068_v13 = vpack.c.bf16 (!%p908_p4), %v306_v11, %v305_v10  ;;  %1067 = vmatprep.subr.bf16.mxu1 (!%p908_p4), %v1066_v8  ;;  %v1070_v18 = vpack.c.bf16 (!%p908_p4), %v324_v16, %v323_v15  ;;  %v275_v19 = vld [vmem:[#allocation7 + $0x10] sm:$0xff] (!%p908_p4)  ;;  %v276_v20 = vld [vmem:[#allocation7 + $0x18] sm:$0xff] (!%p908_p4)  ;;  %v293_v24 = vld [vmem:[#allocation7 + $0xa0] sm:$0xff] (!%p908_p4) }
  0x3d   : > { %1037 = vmatpush3.bf16.msra.mxu0 (!%p908_p4), %v1036_v9  ;;  %v307_v21 = vld [vmem:[#allocation7 + $0x110] sm:$0xff] (!%p908_p4)  ;;  %v1040_v22 = vpack.c.bf16 (!%p908_p4), %v276_v20, %v275_v19  ;;  %v308_v23 = vld [vmem:[#allocation7 + $0x118] sm:$0xff] (!%p908_p4)  ;;  %v294_v25 = vld [vmem:[#allocation7 + $0xa8] sm:$0xff] (!%p908_p4) }
  0x3e   : > { %1069 = vmatpush3.bf16.msra.mxu1 (!%p908_p4), %v1068_v13  ;;  %1039 = vmatprep.subr.bf16.mxu0 (!%p908_p4), %v1038_v17  ;;  %v1072_v26 = vpack.c.bf16 (!%p908_p4), %v308_v23, %v307_v21  ;;  %v1042_v27 = vpack.c.bf16 (!%p908_p4), %v294_v25, %v293_v24  ;;  %v325_v28 = vld [vmem:[#allocation7 + $0x1a0] sm:$0xff] (!%p908_p4)  ;;  %v326_v29 = vld [vmem:[#allocation7 + $0x1a8] sm:$0xff] (!%p908_p4)  ;;  %v295_v36 = vld [vmem:[#allocation7 + $0xb0] sm:$0xff] (!%p908_p4) }
  0x3f   : > { %1071 = vmatprep.subr.bf16.mxu1 (!%p908_p4), %v1070_v18  ;;  %v277_v30 = vld [vmem:[#allocation7 + $0x20] sm:$0xff] (!%p908_p4)  ;;  %v1074_v31 = vpack.c.bf16 (!%p908_p4), %v326_v29, %v325_v28  ;;  %v278_v32 = vld [vmem:[#allocation7 + $0x28] sm:$0xff] (!%p908_p4)  ;;  %v296_v37 = vld [vmem:[#allocation7 + $0xb8] sm:$0xff] (!%p908_p4) }
  0x40   : > { %v309_v33 = vld [vmem:[#allocation7 + $0x120] sm:$0xff]  ;;  %v310_v34 = vld [vmem:[#allocation7 + $0x128] sm:$0xff]  ;;  %v1044_v35 = vpack.c.bf16 %v278_v32, %v277_v30  ;;  %v327_v38 = vld [vmem:[#allocation7 + $0x1b0] sm:$0xff]  ;;  %v1046_v40 = vpack.c.bf16 %v296_v37, %v295_v36 }
  0x41   : > { %1041 = vmatpush3.bf16.msra.mxu0 %v1040_v22  ;;  %v1076_v39 = vpack.c.bf16 %v310_v34, %v309_v33  ;;  %v328_v41 = vld [vmem:[#allocation7 + $0x1b8] sm:$0xff]  ;;  %v279_v42 = vld [vmem:[#allocation7 + $0x30] sm:$0xff]  ;;  %v297_v47 = vld [vmem:[#allocation7 + $0xc0] sm:$0xff] }
  0x42   : > { %1073 = vmatpush3.bf16.msra.mxu1 %v1072_v26  ;;  %1043 = vmatprep.subr.bf16.mxu0 %v1042_v27  ;;  %v280_v43 = vld [vmem:[#allocation7 + $0x38] sm:$0xff]  ;;  %v1078_v44 = vpack.c.bf16 %v328_v41, %v327_v38  ;;  %v311_v45 = vld [vmem:[#allocation7 + $0x130] sm:$0xff]  ;;  %v298_v48 = vld [vmem:[#allocation7 + $0xc8] sm:$0xff] }
  0x43   : > { %1075 = vmatprep.subr.bf16.mxu1 %v1074_v31  ;;  %v312_v46 = vld [vmem:[#allocation7 + $0x138] sm:$0xff]  ;;  %v329_v49 = vld [vmem:[#allocation7 + $0x1c0] sm:$0xff]  ;;  %v330_v50 = vld [vmem:[#allocation7 + $0x1c8] sm:$0xff]  ;;  %v1048_v51 = vpack.c.bf16 %v280_v43, %v279_v42  ;;  %v1050_v53 = vpack.c.bf16 %v298_v48, %v297_v47 }
  0x44   : > { %v1080_v52 = vpack.c.bf16 %v312_v46, %v311_v45  ;;  %v281_v54 = vld [vmem:[#allocation7 + $0x40] sm:$0xff]  ;;  %v282_v55 = vld [vmem:[#allocation7 + $0x48] sm:$0xff]  ;;  %v1082_v57 = vpack.c.bf16 %v330_v50, %v329_v49  ;;  %v299_v59 = vld [vmem:[#allocation7 + $0xd0] sm:$0xff] }
  0x45   : > { %1045 = vmatpush3.bf16.msra.mxu0 %v1044_v35  ;;  %v313_v56 = vld [vmem:[#allocation7 + $0x140] sm:$0xff]  ;;  %v314_v58 = vld [vmem:[#allocation7 + $0x148] sm:$0xff]  ;;  %v300_v60 = vld [vmem:[#allocation7 + $0xd8] sm:$0xff]  ;;  %v1052_v63 = vpack.c.bf16 %v282_v55, %v281_v54 }
  0x46   : > { %1077 = vmatpush3.bf16.msra.mxu1 %v1076_v39  ;;  %1047 = vmatprep.subr.bf16.mxu0 %v1046_v40  ;;  %v331_v61 = vld [vmem:[#allocation7 + $0x1d0] sm:$0xff]  ;;  %v332_v62 = vld [vmem:[#allocation7 + $0x1d8] sm:$0xff]  ;;  %v1084_v0 = vpack.c.bf16 %v314_v58, %v313_v56  ;;  %v1054_v1 = vpack.c.bf16 %v300_v60, %v299_v59  ;;  %v301_v7 = vld [vmem:[#allocation7 + $0xe0] sm:$0xff] }
  0x47   : > { %1079 = vmatprep.subr.bf16.mxu1 %v1078_v44  ;;  %v283_v2 = vld [vmem:[#allocation7 + $0x50] sm:$0xff]  ;;  %v284_v3 = vld [vmem:[#allocation7 + $0x58] sm:$0xff]  ;;  %v1086_v5 = vpack.c.bf16 %v332_v62, %v331_v61  ;;  %v302_v8 = vld [vmem:[#allocation7 + $0xe8] sm:$0xff] }
  0x48   : > { %v315_v4 = vld [vmem:[#allocation7 + $0x150] sm:$0xff]  ;;  %v316_v6 = vld [vmem:[#allocation7 + $0x158] sm:$0xff]  ;;  %v333_v9 = vld [vmem:[#allocation7 + $0x1e0] sm:$0xff]  ;;  %v1056_v11 = vpack.c.bf16 %v284_v3, %v283_v2  ;;  %v1058_v15 = vpack.c.bf16 %v302_v8, %v301_v7 }
  0x49   : > { %1049 = vmatpush3.bf16.msra.mxu0 %v1048_v51  ;;  %v334_v10 = vld [vmem:[#allocation7 + $0x1e8] sm:$0xff]  ;;  %v285_v12 = vld [vmem:[#allocation7 + $0x60] sm:$0xff]  ;;  %v1088_v14 = vpack.c.bf16 %v316_v6, %v315_v4  ;;  %v258_v17 = vld [vmem:[%s1507_s0 + $0x8] sm:$0xff] }
  0x4a   : > { %1081 = vmatpush3.bf16.msra.mxu1 %v1080_v52  ;;  %1051 = vmatprep.subr.bf16.mxu0 %v1050_v53  ;;  %v286_v13 = vld [vmem:[#allocation7 + $0x68] sm:$0xff]  ;;  %v317_v16 = vld [vmem:[#allocation7 + $0x160] sm:$0xff]  ;;  %v1090_v19 = vpack.c.bf16 %v334_v10, %v333_v9  ;;  %v303_v21 = vld [vmem:[#allocation7 + $0xf0] sm:$0xff]  ;;  %v1308_v52 = vmov 0.0|0.0  }
  0x4b   : > { %1083 = vmatprep.subr.bf16.mxu1 %v1082_v57  ;;  %v260_v18 = vld [vmem:[%s1507_s0 + $0x18] sm:$0xff]  ;;  %v304_v22 = vld [vmem:[#allocation7 + $0xf8] sm:$0xff]  ;;  %461 = vmatprep.mubr.f32.mxu0 %v258_v17  ;;  %v335_v23 = vld [vmem:[#allocation7 + $0x1f0] sm:$0xff]  ;;  %v1060_v25 = vpack.c.bf16 %v286_v13, %v285_v12 }
  0x4c   : > { %v318_v20 = vld [vmem:[#allocation7 + $0x168] sm:$0xff]  ;;  %v336_v24 = vld [vmem:[#allocation7 + $0x1f8] sm:$0xff]  ;;  %536 = vmatprep.mubr.f32.mxu1 %v260_v18  ;;  %v1062_v27 = vpack.c.bf16 %v304_v22, %v303_v21  ;;  %v287_v28 = vld [vmem:[#allocation7 + $0x70] sm:$0xff] }
  0x4d   : > { %1053 = vmatpush3.bf16.msra.mxu0 %v1052_v63  ;;  %v1092_v26 = vpack.c.bf16 %v318_v20, %v317_v16  ;;  %v288_v29 = vld [vmem:[#allocation7 + $0x78] sm:$0xff]  ;;  %v319_v30 = vld [vmem:[#allocation7 + $0x170] sm:$0xff]  ;;  %v1094_v31 = vpack.c.bf16 %v336_v24, %v335_v23  ;;  %v353_v33 = vld [vmem:[#allocation7 + $0x280] sm:$0xff] }
  0x4e   : > { %1085 = vmatpush3.bf16.msra.mxu1 %v1084_v0  ;;  %1055 = vmatprep.subr.bf16.mxu0 %v1054_v1  ;;  %v320_v32 = vld [vmem:[#allocation7 + $0x178] sm:$0xff]  ;;  %v354_v34 = vld [vmem:[#allocation7 + $0x288] sm:$0xff]  ;;  %v1064_v35 = vpack.c.bf16 %v288_v29, %v287_v28  ;;  %v337_v38 = vld [vmem:[#allocation7 + $0x200] sm:$0xff] }
  0x4f   : > { %1087 = vmatprep.subr.bf16.mxu1 %v1086_v5  ;;  %v1096_v36 = vpack.c.bf16 %v320_v32, %v319_v30  ;;  %v1098_v37 = vpack.c.bf16 %v354_v34, %v353_v33  ;;  %v338_v39 = vld [vmem:[#allocation7 + $0x208] sm:$0xff]  ;;  %v369_v40 = vld [vmem:[#allocation7 + $0x300] sm:$0xff]  ;;  %v355_v42 = vld [vmem:[#allocation7 + $0x290] sm:$0xff] }
  0x50   : > { %v370_v41 = vld [vmem:[#allocation7 + $0x308] sm:$0xff]  ;;  %v356_v43 = vld [vmem:[#allocation7 + $0x298] sm:$0xff]  ;;  %v1100_v46 = vpack.c.bf16 %v338_v39, %v337_v38  ;;  %v339_v49 = vld [vmem:[#allocation7 + $0x210] sm:$0xff] }
  0x51   : > { %1057 = vmatpush3.bf16.msra.mxu0 %v1056_v11  ;;  %v257_v44 = vld [vmem:[%s1507_s0] sm:$0xff]  ;;  %v259_v45 = vld [vmem:[%s1507_s0 + $0x10] sm:$0xff]  ;;  %v1131_v47 = vpack.c.bf16 %v370_v41, %v369_v40  ;;  %v1102_v48 = vpack.c.bf16 %v356_v43, %v355_v42  ;;  %v266_v58 = vld [vmem:[%s1507_s0 + $0x48] sm:$0xff] }
  0x52   : > { %1089 = vmatpush3.bf16.msra.mxu1 %v1088_v14  ;;  %1059 = vmatprep.subr.bf16.mxu0 %v1058_v15  ;;  %v340_v50 = vld [vmem:[#allocation7 + $0x218] sm:$0xff]  ;;  %v371_v51 = vld [vmem:[#allocation7 + $0x310] sm:$0xff]  ;;  %v357_v54 = vld [vmem:[#allocation7 + $0x2a0] sm:$0xff] }
  0x53   : > { %1091 = vmatprep.subr.bf16.mxu1 %v1090_v19  ;;  %v372_v53 = vld [vmem:[#allocation7 + $0x318] sm:$0xff]  ;;  %v358_v55 = vld [vmem:[#allocation7 + $0x2a8] sm:$0xff]  ;;  %v341_v56 = vld [vmem:[#allocation7 + $0x220] sm:$0xff]  ;;  %v1104_v57 = vpack.c.bf16 %v340_v50, %v339_v49 }
  0x54   : > { %v268_v59 = vld [vmem:[%s1507_s0 + $0x58] sm:$0xff]  ;;  %v265_v60 = vld [vmem:[%s1507_s0 + $0x40] sm:$0xff]  ;;  %v1134_v61 = vpack.c.bf16 %v372_v53, %v371_v51  ;;  %v1106_v62 = vpack.c.bf16 %v358_v55, %v357_v54  ;;  %v267_v1 = vld [vmem:[%s1507_s0 + $0x50] sm:$0xff]  ;;  %v1309_v55 = vmov 0.0  }
  0x55   : > { %1061 = vmatpush3.bf16.msra.mxu0 %v1060_v25  ;;  %v342_v63 = vld [vmem:[#allocation7 + $0x228] sm:$0xff]  ;;  %v373_v0 = vld [vmem:[#allocation7 + $0x320] sm:$0xff]  ;;  %v359_v3 = vld [vmem:[#allocation7 + $0x2b0] sm:$0xff] }
  0x56   : > { %1093 = vmatpush3.bf16.msra.mxu1 %v1092_v26  ;;  %1063 = vmatprep.subr.bf16.mxu0 %v1062_v27  ;;  %v374_v2 = vld [vmem:[#allocation7 + $0x328] sm:$0xff]  ;;  %v360_v4 = vld [vmem:[#allocation7 + $0x2b8] sm:$0xff]  ;;  %v1108_v6 = vpack.c.bf16 %v342_v63, %v341_v56  ;;  %v343_v7 = vld [vmem:[#allocation7 + $0x230] sm:$0xff] }
  0x57   : > { %1095 = vmatprep.subr.bf16.mxu1 %v1094_v31  ;;  %v262_v5 = vld [vmem:[%s1507_s0 + $0x28] sm:$0xff]  ;;  %v1137_v8 = vpack.c.bf16 %v374_v2, %v373_v0  ;;  %v1110_v9 = vpack.c.bf16 %v360_v4, %v359_v3  ;;  %v264_v12 = vld [vmem:[%s1507_s0 + $0x38] sm:$0xff]  ;;  %v261_v53 = vld [vmem:[%s1507_s0 + $0x20] sm:$0xff] }
  0x58   : > { %v344_v10 = vld [vmem:[#allocation7 + $0x238] sm:$0xff]  ;;  %v375_v11 = vld [vmem:[#allocation7 + $0x330] sm:$0xff]  ;;  %v361_v14 = vld [vmem:[#allocation7 + $0x2c0] sm:$0xff] }
  0x59   : > { %1065 = vmatpush3.bf16.msra.mxu0 %v1064_v35  ;;  %v376_v13 = vld [vmem:[#allocation7 + $0x338] sm:$0xff]  ;;  %v362_v15 = vld [vmem:[#allocation7 + $0x2c8] sm:$0xff]  ;;  %v1112_v16 = vpack.c.bf16 %v344_v10, %v343_v7  ;;  %v345_v19 = vld [vmem:[#allocation7 + $0x240] sm:$0xff] }
  0x5a   : > { %1097 = vmatpush3.bf16.msra.mxu1 %v1096_v36  ;;  %1099 = vmatprep.subr.bf16.mxu0 %v1098_v37  ;;  %v1140_v17 = vpack.c.bf16 %v376_v13, %v375_v11  ;;  %v1114_v18 = vpack.c.bf16 %v362_v15, %v361_v14  ;;  %v346_v20 = vld [vmem:[#allocation7 + $0x248] sm:$0xff]  ;;  %v377_v21 = vld [vmem:[#allocation7 + $0x340] sm:$0xff]  ;;  %v363_v23 = vld [vmem:[#allocation7 + $0x2d0] sm:$0xff] }
  0x5b   : > { %1130 = vmatprep.subr.bf16.mxu1 %v1308_v52  ;;  %v378_v22 = vld [vmem:[#allocation7 + $0x348] sm:$0xff]  ;;  %v364_v24 = vld [vmem:[#allocation7 + $0x2d8] sm:$0xff]  ;;  %v1116_v25 = vpack.c.bf16 %v346_v20, %v345_v19  ;;  %v347_v28 = vld [vmem:[#allocation7 + $0x250] sm:$0xff] }
  0x5c   : > { %462 = vmatmul.mubr.f32.vlgmr.msra.gmra.mrb[0].mxu0 %v257_v44  ;;  %v1143_v26 = vpack.c.bf16 %v378_v22, %v377_v21  ;;  %v1118_v27 = vpack.c.bf16 %v364_v24, %v363_v23  ;;  %v348_v29 = vld [vmem:[#allocation7 + $0x258] sm:$0xff]  ;;  %v379_v30 = vld [vmem:[#allocation7 + $0x350] sm:$0xff]  ;;  %v365_v32 = vld [vmem:[#allocation7 + $0x2e0] sm:$0xff] }
  0x5d   : > { %537 = vmatmul.mubr.f32.vlgmr.msra.gmra.mrb[0].mxu1 %v259_v45  ;;  %1101 = vmatpush3.bf16.msra.mxu0 %v1100_v46  ;;  %v380_v31 = vld [vmem:[#allocation7 + $0x358] sm:$0xff]  ;;  %v366_v33 = vld [vmem:[#allocation7 + $0x2e8] sm:$0xff]  ;;  %v1120_v34 = vpack.c.bf16 %v348_v29, %v347_v28  ;;  %v349_v37 = vld [vmem:[#allocation7 + $0x260] sm:$0xff] }
  0x5e   : > { %1132 = vmatpush1.bf16.msra.mxu1 %v1131_v47  ;;  %1103 = vmatprep.subr.bf16.mxu0 %v1102_v48  ;;  %v1146_v35 = vpack.c.bf16 %v380_v31, %v379_v30  ;;  %v1122_v36 = vpack.c.bf16 %v366_v33, %v365_v32  ;;  %v350_v38 = vld [vmem:[#allocation7 + $0x268] sm:$0xff]  ;;  %v381_v39 = vld [vmem:[#allocation7 + $0x360] sm:$0xff]  ;;  %v367_v41 = vld [vmem:[#allocation7 + $0x2f0] sm:$0xff] }
  0x5f   : > { %1133 = vmatprep.subr.bf16.mxu1 %v1308_v52  ;;  %466 = vmatprep.mubr.f32.mxu0 %v266_v58  ;;  %v382_v40 = vld [vmem:[#allocation7 + $0x368] sm:$0xff]  ;;  %v368_v42 = vld [vmem:[#allocation7 + $0x2f8] sm:$0xff]  ;;  %v1124_v43 = vpack.c.bf16 %v350_v38, %v349_v37  ;;  %v351_v46 = vld [vmem:[#allocation7 + $0x270] sm:$0xff] }
  0x60   : > { %541 = vmatprep.mubr.f32.mxu1 %v268_v59  ;;  %467 = vmatmul.mubr.f32.gmra.mrb[2].mxu0 %v265_v60  ;;  %v1149_v44 = vpack.c.bf16 %v382_v40, %v381_v39  ;;  %v1126_v45 = vpack.c.bf16 %v368_v42, %v367_v41  ;;  %v352_v47 = vld [vmem:[#allocation7 + $0x278] sm:$0xff]  ;;  %v383_v48 = vld [vmem:[#allocation7 + $0x370] sm:$0xff]  ;;  %v385_v56 = vld [vmem:[#allocation7 + $0x380] sm:$0xf] }
  0x61   : > { %1105 = vmatpush3.bf16.msra.mxu0 %v1104_v57  ;;  %542 = vmatmul.mubr.f32.gmra.mrb[2].mxu1 %v267_v1  ;;  %v384_v49 = vld [vmem:[#allocation7 + $0x378] sm:$0xff]  ;;  %v1128_v50 = vpack.c.bf16 %v352_v47, %v351_v46  ;;  %v272_v58 = vld [vmem:[%s1507_s0 + $0x78] sm:$0xff] }
  0x62   : > { %1135 = vmatpush1.bf16.msra.mxu1 %v1134_v61  ;;  %1107 = vmatprep.subr.bf16.mxu0 %v1106_v62  ;;  %v1152_v51 = vpack.c.bf16 %v384_v49, %v383_v48  ;;  %v270_v54 = vld [vmem:[%s1507_s0 + $0x68] sm:$0xff]  ;;  %v263_v57 = vld [vmem:[%s1507_s0 + $0x30] sm:$0xff] }
  0x63   : > { %1136 = vmatprep.subr.bf16.mxu1 %v1308_v52  ;;  %611 = vmatprep.mubr.f32.mxu0 %v262_v5  ;;  %v271_v59 = vld [vmem:[%s1507_s0 + $0x70] sm:$0xff] }
  0x64   : > { %910 = vmatprep.mubr.msk.f32.mxu1 %vm386_vm0, %v264_v12  ;;  %v701_v37 = vld [vmem:[#allocation3] sm:$0x1]  ;;  %v711_v40 = vld [vmem:[#allocation4] sm:$0x1] }
  0x65   : > { %1109 = vmatpush3.bf16.msra.mxu0 %v1108_v6 }
  0x66   : > { %1138 = vmatpush1.bf16.msra.mxu1 %v1137_v8  ;;  %1111 = vmatprep.subr.bf16.mxu0 %v1110_v9 }
  0x67   : > { %1139 = vmatprep.subr.bf16.mxu1 %v1308_v52 }
  0x69   : > { %1113 = vmatpush3.bf16.msra.mxu0 %v1112_v16 }
  0x6a   : > { %1141 = vmatpush1.bf16.msra.mxu1 %v1140_v17  ;;  %1115 = vmatprep.subr.bf16.mxu0 %v1114_v18 }
  0x6b   : > { %1142 = vmatprep.subr.bf16.mxu1 %v1308_v52 }
  0x6d   : > { %1117 = vmatpush3.bf16.msra.mxu0 %v1116_v25 }
  0x6e   : > { %1144 = vmatpush1.bf16.msra.mxu1 %v1143_v26  ;;  %1119 = vmatprep.subr.bf16.mxu0 %v1118_v27 }
  0x6f   : > { %1145 = vmatprep.subr.bf16.mxu1 %v1308_v52 }
  0x71   : > { %1121 = vmatpush3.bf16.msra.mxu0 %v1120_v34 }
  0x72   : > { %1147 = vmatpush1.bf16.msra.mxu1 %v1146_v35  ;;  %1123 = vmatprep.subr.bf16.mxu0 %v1122_v36 }
  0x73   : > { %1148 = vmatprep.subr.bf16.mxu1 %v1308_v52 }
  0x75   : > { %1125 = vmatpush3.bf16.msra.mxu0 %v1124_v43 }
  0x76   : > { %1150 = vmatpush1.bf16.msra.mxu1 %v1149_v44  ;;  %1127 = vmatprep.subr.bf16.mxu0 %v1126_v45 }
  0x77   : > { %1151 = vmatprep.subr.bf16.mxu1 %v1308_v52  ;;  %v269_v52 = vld [vmem:[%s1507_s0 + $0x60] sm:$0xff] }
  0x79   : > { %1129 = vmatpush3.bf16.msra.mxu0 %v1128_v50 }
  0x7a   : > { %1153 = vmatpush1.bf16.msra.mxu1 %v1152_v51 }
  0x7b   : > { %654 = vmatprep.subr.mxu1 %v1309_v55 }
  0x7c   : > { %612 = vmatmul.mubr.f32.vlgmr.msra.gmra.mrb[4].mxu0 %v261_v53 }
  0x7d   : > { %616 = vmatprep.mubr.f32.mxu0 %v270_v54 }
  0x7e   : > { %909 = vmatpush1.msk.msra.mxu1 %vm393_vm1, %v385_v56 }
  0x7f   : > { %687 = vmatmul.mubr.f32.vlgmr.msra.gmra.mrb[4].mxu1 %v263_v57 }
  0x80   : > { %617 = vmatmul.mubr.f32.gmra.mrb[6].mxu0 %v269_v52  ;;  %911 = vmatprep.mubr.msk.f32.mxu1 %vm386_vm0, %v272_v58 }
  0x83   : > { %692 = vmatmul.mubr.f32.gmra.mrb[6].mxu1 %v271_v59 }
 0x12f   : > { %v952_v60 = vpop.f32.mrb[0].mxu0 }
 0x130   : > { %v990_v61 = vpop.f32.mrb[0].mxu1  ;;  %v953_v62 = vpop.f32.mrb[1].mxu0 }
 0x131   : > { %v954_v63 = vadd.f32 %v953_v62, %v952_v60  ;;  %v991_v0 = vpop.f32.mrb[1].mxu1 }
 0x132   : > { %v992_v1 = vadd.f32 %v991_v0, %v990_v61 }
 0x133   : > { %v955_v2 = vpop.f32.mrb[2].mxu0 }
 0x134   : > { %v539_v3 = vadd.f32 %v992_v1, %v954_v63  ;;  %v993_v4 = vpop.f32.mrb[2].mxu1  ;;  %v956_v5 = vpop.f32.mrb[3].mxu0 }
 0x135   : > { %v957_v6 = vadd.f32 %v956_v5, %v955_v2  ;;  %v994_v7 = vpop.f32.mrb[3].mxu1 }
 0x136   : > { %v995_v8 = vadd.f32 %v994_v7, %v993_v4 }
 0x138   : > { %v544_v9 = vadd.f32 %v995_v8, %v957_v6 }
 0x14f   : > { %v1028_v10 = vpop.f32.mrb[4].mxu0 }
 0x150   : > { %v1029_v11 = vpop.f32.mrb[5].mxu0 }
 0x151   : > { %v1030_v12 = vadd.f32 %v1029_v11, %v1028_v10 }
 0x152   : > { %v688_v13 = vpop.f32.mrb[4].mxu1 }
 0x153   : > { %v1031_v14 = vpop.f32.mrb[6].mxu0  ;;  %v614_v15 = vadd.f32 %v1030_v12, %v539_v3  ;;  %v690_v16 = vpop.f32.mrb[5].mxu1 }
 0x154   : > { %v1032_v17 = vpop.f32.mrb[7].mxu0 }
 0x155   : > { %v689_v18 = vadd.f32 %v688_v13, %v614_v15  ;;  %v1033_v19 = vadd.f32 %v1032_v17, %v1031_v14 }
 0x156   : > { %v693_v20 = vpop.f32.mrb[6].mxu1 }
 0x157   : > { %699 = vst [vmem:[#allocation2] sm:$0xff] %v689_v18  ;;  %v619_v21 = vadd.f32 %v1033_v19, %v544_v9  ;;  %v695_v22 = vpop.f32.mrb[7].mxu1  ;;  %v712_v24 = vmul.f32 %v689_v18, %v689_v18 }
 0x159   : > { %v694_v23 = vadd.f32 %v693_v20, %v619_v21 }
 0x15b   : > { %700 = vst [vmem:[#allocation2 + $0x8] sm:$0xff] %v694_v23  ;;  %v702_v25 = vadd.f32 %v694_v23, %v689_v18  ;;  %v713_v26 = vmul.f32 %v694_v23, %v694_v23 }
 0x15d   : > { %v703_v27 = vrot.slane %v702_v25, 4  ;;  %v714_v28 = vadd.f32 %v713_v26, %v712_v24 }
 0x15f   : > { %v704_v29 = vadd.f32 %v703_v27, %v702_v25  ;;  %v715_v30 = vrot.slane %v714_v28, 4 }
 0x161   : > { %v705_v31 = vrot.slane %v704_v29, 2  ;;  %v716_v32 = vadd.f32 %v715_v30, %v714_v28 }
 0x163   : > { %v706_v33 = vadd.f32 %v705_v31, %v704_v29  ;;  %v717_v34 = vrot.slane %v716_v32, 2 }
 0x165   : > { %v707_v35 = vrot.slane %v706_v33, 1  ;;  %v718_v36 = vadd.f32 %v717_v34, %v716_v32 }
 0x167   : > { %v708_v38 = vadd.f32 %v707_v35, %v706_v33  ;;  %v719_v39 = vrot.slane %v718_v36, 1 }
 0x169   : > { %v709_v41 = vadd.f32 %v708_v38, %v701_v37  ;;  %v720_v42 = vadd.f32 %v719_v39, %v718_v36 }
 0x16b   : > { %710 = vst [vmem:[#allocation3] sm:$0x1] %v709_v41  ;;  %v721_v43 = vadd.f32 %v720_v42, %v711_v40 }
 0x16d   : > { %722 = vst [vmem:[#allocation4] sm:$0x1] %v721_v43 }
 0x16e PF: > { %724 = sbr.rel (!%p246_p3) target bundleno = 399 (0x18f), region = 52  ;;  %v732_v53 = vld [vmem:[%s1509_s2] sm:$0x1] (%p246_p3) }
 0x16f   : > { %v737_v56 = vld [vmem:[%s1510_s3] sm:$0x1] (%p246_p3) }
 0x172   : > { %v725_v44 = vld [vmem:[#allocation3] sm:$0x1] (%p246_p3) }
 0x173   : > { %v726_v46 = vmul.f32 (%p246_p3), 0.0625, %v725_v44 }
 0x174   : > { %v727_v45 = vld [vmem:[#allocation4] sm:$0x1] (%p246_p3) }
 0x175   : > { %v728_v47 = vmul.f32 0.0625, %v727_v45  ;;  %v729_v48 = vmul.f32 %v726_v46, %v726_v46 }
 0x177   : > { %v730_v49 = vsub.f32 %v728_v47, %v729_v48 }
 0x179   : > { %v731_v50 = vmax.f32 %v730_v49, 0.0 }
 0x17b   : > { %v733_v51 = vadd.f32 1e-05, %v731_v50 }
 0x17d   : > { %1208 = vrsqrt.f32 %v733_v51 }
 0x187   : > { %v1209_v54 = vpop.eup %1208 }
 0x188   : > { %v735_v55 = vmul.f32 %v1209_v54, %v732_v53 }
 0x18a   : > { %736 = vst [vmem:[#allocation5] sm:$0x1] %v735_v55  ;;  %v738_v57 = vmul.f32 %v735_v55, %v726_v46 }
 0x18c   : > { %v739_v52 = vsub.f32 %v737_v56, %v738_v57 }
 0x18e   : > { %740 = vst [vmem:[#allocation6] sm:$0x1] %v739_v52 }
 0x18f PF: > { %p912_p6 = scmp.ne.s32.totalorder %s1294_s15, 1 }
 0x190   : > { %v747_v58 = vld [vmem:[#allocation2] sm:$0xff] (!%p912_p6)  ;;  %v748_v62 = vld [vmem:[#allocation2 + $0x8] sm:$0xff] (!%p912_p6)  ;;  %vm795_vm5 = vcmask (!%p912_p6), 801792  }
 0x191   : > { %744 = sbr.rel (%p912_p6) target bundleno = 442 (0x1ba), region = 56  ;;  %v913_v59 = vld [vmem:[#allocation5] ss:$0 sm:$0xff] (!%p912_p6) }
 0x192   : > { %v756_v61 = vmul.f32 (!%p912_p6), %v913_v59, %v747_v58  ;;  %v757_v63 = vmul.f32 (!%p912_p6), %v913_v59, %v748_v62 }
 0x195   : > { %v914_v60 = vld [vmem:[#allocation6] ss:$0 sm:$0xff] (!%p912_p6) }
 0x196   : > { %v765_v0 = vadd.f32 (!%p912_p6), %v914_v60, %v756_v61  ;;  %v766_v1 = vadd.f32 (!%p912_p6), %v914_v60, %v757_v63 }
 0x198   : > { %v767_v2 = vmin.f32 %v765_v0, 20.0  ;;  %v768_v3 = vmin.f32 %v766_v1, 20.0  ;;  %vm791_vm3 = vcmp.gt.f32.partialorder %v765_v0, 20.0  ;;  %vm792_vm6 = vcmp.gt.f32.partialorder %v766_v1, 20.0 }
 0x19a   : > { %v769_v4 = vmul.f32 1.442695, %v767_v2  ;;  %v771_v5 = vmul.f32 1.442695, %v768_v3 }
 0x19c   : > { %1210 = vpow2.f32 %v769_v4 }
 0x19d   : > { %1212 = vpow2.f32 %v771_v5 }
 0x1a6   : > { %v1211_v6 = vpop.eup %1210 }
 0x1a7   : > { %v1213_v7 = vpop.eup %1212  ;;  %v773_v8 = vadd.f32 1.0, %v1211_v6  ;;  %v776_v10 = vmul.f32 -0.5, %v1211_v6  ;;  %v779_v13 = vand.u32 2147483647, %v1211_v6 }
 0x1a8   : > { %v782_v9 = vadd.f32 1.0, %v1213_v7  ;;  %v785_v11 = vmul.f32 -0.5, %v1213_v7  ;;  %v788_v15 = vand.u32 2147483647, %v1213_v7 }
 0x1a9   : > { %1214 = vlog2.f32 %v773_v8  ;;  %v777_v12 = vadd.f32 1.0, %v776_v10  ;;  %vm780_vm2 = vcmp.lt.f32.partialorder %v779_v13, 0.0004427343 }
 0x1aa   : > { %1216 = vlog2.f32 %v782_v9  ;;  %v786_v14 = vadd.f32 1.0, %v785_v11  ;;  %vm789_vm4 = vcmp.lt.f32.partialorder %v788_v15, 0.0004427343 }
 0x1ab   : > { %v778_v16 = vmul.f32 %v1211_v6, %v777_v12 }
 0x1ac   : > { %v787_v18 = vmul.f32 %v1213_v7, %v786_v14 }
 0x1b3   : > { %v1215_v17 = vpop.eup %1214 }
 0x1b4   : > { %v1217_v19 = vpop.eup %1216  ;;  %v775_v20 = vmul.f32 0.6931472, %v1215_v17 }
 0x1b5   : > { %v784_v21 = vmul.f32 0.6931472, %v1217_v19 }
 0x1b6   : > { %v781_v22 = vsel %vm780_vm2, %v778_v16, %v775_v20 }
 0x1b7   : > { %v793_v23 = vsel %vm791_vm3, %v765_v0, %v781_v22  ;;  %v790_v24 = vsel %vm789_vm4, %v787_v18, %v784_v21 }
 0x1b8   : > { %796 = vst.msk [vmem:[#allocation10] sm:$0xff] %vm795_vm5, %v793_v23  ;;  %v794_v25 = vsel %vm792_vm6, %v766_v1, %v790_v24 }
 0x1b9   : > { %797 = vst.msk [vmem:[#allocation10 + $0x8] sm:$0xff] %vm795_vm5, %v794_v25 }
 0x1ba PF: > { %p1473_p8 = scmp.eq.s32.totalorder %s899_s18, 1  ;;  %s1310_s8 = smov [#allocation10]  }
 0x1bb   : > { %s813_s9 = sshll.u32 %s1310_s8, 4  ;;  %s814_s9 = int_to_ptr.vmem [resolvable:$true] %s813_s9 }
 0x1bc   : > { %s1246_s10 = scalar_lea.vmem %s814_s9, 256  ;;  %s1252_s11 = scalar_lea.vmem %s814_s9, 512 }
 0x1bd   : > { %p1247_p10 = scmp.ne.s32.totalorder %s814_s9, %s1246_s10  ;;  %p1253_p13 = scmp.lt.s32.totalorder %s814_s9, %s814_s9 }
 0x1be   : > { %p1254_p0 = scmp.lt.s32.totalorder %s1252_s11, %s1246_s10 }
 0x1bf   : > { %p1248_p11 = pnand %p1247_p10, %p1473_p8 }
 0x1c0   : > { %p1255_p1 = por %p1254_p0, %p1253_p13 }
 0x1c1   : > { %p1249_p12 = pneg %p1248_p11 }
 0x1c3   : > { %p1256_p2 = pnand %p1255_p1, %p1249_p12 }
 0x1c5   : > { %1259 = shalt.err (!%p1256_p2)
}
 0x1c6   : > { %s1260_s13 = scalar_lea.hbm %s1511_s4, 256 }
 0x1c7   : > { %p1261_p5 = scmp.ne.s32.totalorder %s1511_s4, %s1260_s13  ;;  %p1266_p3 = scmp.lt.u32.totalorder %s1260_s13, %s1511_s4 }
 0x1c9   : > { %p1262_p7 = pnand %p1261_p5, %p1473_p8 }
 0x1cb   : > { %p1263_p9 = pneg %p1262_p7 }
 0x1cd   : > { %p1268_p4 = pnand %p1266_p3, %p1263_p9 }
 0x1cf   : > { %1271 = shalt.err (!%p1268_p4)
}
 0x1d0   : > { %s1311_s24 = smov 128   ;;  %s1312_s25 = smov 8  }
 0x1d1   : > { %1159 = dma.vmem_to_hbm [thread:$0]  (%p1473_p8), %s814_s9, 256, %s1511_s4, [#allocation9], %s1311_s24, %s1311_s24, %s1312_s25  }
 0x1d2 PF: > { %p1173_p6 = scmp.ge.s32.totalorder %s1302_s17, 2  ;;  %p1174_p10 = scmp.eq.s32.totalorder %s900_s19, 1 }
 0x1d4   : > { %p1167_p11 = pnand %p1174_p10, %p1173_p6 }
 0x1d6   : > { %1289 = dma.done.wait (!%p1167_p11), [#allocation9], 256  }
 0x1d7   : > { %1291 = vsyncadd (!%p1167_p11), [#allocation9], 4294967040  ;;  %s18_s17 = sadd.s32 1, %s1302_s17   ;;  %s1521_s15 = smov %s1298_s16 }
 0x1d8   : > { %p15_p12 = scmp.ge.s32.totalorder %s18_s17, 4   ;;  %s1522_s16 = smov %s1524_s20 }
 0x1da   :  { %17 = sbr.rel (!%p15_p12) target bundleno = 4 (0x4), region = 94 }
 0x1e1   :  { %834 = vsyncpa [#allocation8], 1 }
 0x1e2   :  { %836 = vsyncpa [#allocation8 + $0x1], 1 }
 0x1e3   :  { %837 = vsyncpa [#allocation9], 1 }
 0x1e4   :  { %839 = vsyncpa [#allocation9 + $0x1], 1 }

</bundles_post_ra>
